<compile_context>
chip_gen: v5e
topology: v5e:2x2
jax: 0.10.0
libtpu: 0.0.40
codegen_flags: <defaults>
</compile_context>

<pallas_src>
import jax
import jax.numpy as jnp
import numpy as np
from jax.experimental import pallas as pl
from jax.experimental.pallas import tpu as pltpu


def _transition_kernel(x_ref, scale_ref, shift_ref, w_ref, o_ref):
    # x_ref:     (1, 2, 2, TS, Cin)   bf16; leading (2, 2) are the 2x2 pool-window offsets
    # scale_ref: (1, Cin)             f32; 0.25 * gamma / sqrt(var + eps)
    # shift_ref: (1, Cin)             f32; 0.25 * (beta - mean * gamma / sqrt(var + eps))
    # w_ref:     (Cin, Cout_p)        bf16 1x1-conv weight, lane-padded Cout
    # o_ref:     (1, TS, Cout_p)      bf16 output tile (flattened HO*WO spatial)
    scale = scale_ref[...]            # (1, Cin) f32, broadcasts over rows
    shift = shift_ref[...]

    def bn_relu(i, j):
        x = x_ref[0, i, j].astype(jnp.float32)          # (TS, Cin)
        return jnp.maximum(x * scale + shift, 0.0)       # folded BN + ReLU (pool factor folded)

    # 2x2 average pool == sum of the four window slices (0.25 already folded into scale/shift).
    acc = bn_relu(0, 0) + bn_relu(0, 1) + bn_relu(1, 0) + bn_relu(1, 1)   # (TS, Cin) f32

    # 1x1 conv == single 2-D MXU matmul: bf16 operands, f32 accumulation.
    z = jnp.dot(acc.astype(jnp.bfloat16), w_ref[...],
                preferred_element_type=jnp.float32)       # (TS, Cout_p)

    o_ref[0] = z.astype(o_ref.dtype)


def _pick_tile_s(S, Cin, Cout_p, N, budget_bytes=10 << 20):
    """Largest spatial tile TS dividing S=HO*WO that fits a conservative VMEM budget.

    Footprint accounts for double-buffered bf16 input/output tiles, the double-buffered
    resident bf16 weight, and the in-kernel f32 temporaries.  Budget is kept small enough
    to be safe on v7x (64 MiB VMEM) while large tiles are not needed to saturate HBM.
    When N == 1, prefer >= 2 spatial tiles so both v7x TensorCores get work.
    """
    cands = [t for t in range(8, S + 1, 8) if S % t == 0]
    if not cands:
        cands = [S]  # tiny spatial extent: full-extent block is always legal

    def footprint(t):
        return (2 * 4 * t * Cin * 2          # 2x double-buffered bf16 input (4 window slices)
                + 2 * t * Cout_p * 2         # 2x double-buffered bf16 output
                + 2 * Cin * Cout_p * 2       # double-buffered bf16 weight (resident)
                + (2 * t * Cin + t * Cout_p) * 4)  # f32 temporaries (upcast, acc, matmul result)

    fitting = [t for t in cands if footprint(t) <= budget_bytes]
    if not fitting:
        fitting = [min(cands)]
    if N == 1:
        multi = [t for t in fitting if S // t >= 2]
        if multi:
            return max(multi)
    return max(fitting)


@jax.jit
def transition_layer(x_nchw, gamma, beta, conv_w, eps=1e-5):
    """x_nchw: (N, Cin, H, W) float32; conv_w: (Cout, Cin, 1, 1). Returns (N, Cout, H/2, W/2)."""
    N, Cin, H, W = x_nchw.shape
    Cout = conv_w.shape[0]
    assert H % 2 == 0 and W % 2 == 0, "DenseNet transition expects even H, W"
    HO, WO = H // 2, W // 2
    S = HO * WO

    # Training-mode batch statistics in f32 on the original NCHW tensor (single pass).
    # Clamp the variance (E[x^2] - mean^2 can go slightly negative numerically).
    mean = jnp.mean(x_nchw, axis=(0, 2, 3))
    var = jnp.maximum(jnp.mean(jnp.square(x_nchw), axis=(0, 2, 3)) - jnp.square(mean), 0.0)
    inv = jax.lax.rsqrt(var + eps)
    # Fold the 0.25 average-pool factor into the BN affine (valid: relu is positively homogeneous).
    scale = (0.25 * gamma * inv).astype(jnp.float32)
    shift = (0.25 * (beta - mean * gamma * inv)).astype(jnp.float32)

    # bf16 activations, pool-window offsets hoisted to leading axes, spatial flattened:
    # (N, C, H, W) -> (N, 2, 2, HO*WO, C).  One fused XLA transpose pass over bf16 data.
    xt = x_nchw.astype(jnp.bfloat16).reshape(N, Cin, HO, 2, WO, 2)
    xt = jnp.transpose(xt, (0, 3, 5, 2, 4, 1)).reshape(N, 2, 2, S, Cin)

    # 1x1 conv weight as (Cin, Cout), bf16 for the MXU, lane-padded to a multiple of 128.
    Cout_p = ((Cout + 127) // 128) * 128
    w = conv_w.reshape(Cout, Cin).T.astype(jnp.bfloat16)
    if Cout_p != Cout:
        w = jnp.pad(w, ((0, 0), (0, Cout_p - Cout)))

    TS = _pick_tile_s(S, Cin, Cout_p, N)

    out_flat = pl.pallas_call(
        _transition_kernel,
        out_shape=jax.ShapeDtypeStruct((N, S, Cout_p), jnp.bfloat16),
        grid_spec=pltpu.PrefetchScalarGridSpec(
            num_scalar_prefetch=0,
            grid=(N, S // TS),
            in_specs=[
                pl.BlockSpec((1, 2, 2, TS, Cin), lambda n, s: (n, 0, 0, s, 0)),
                pl.BlockSpec((1, Cin), lambda n, s: (0, 0)),
                pl.BlockSpec((1, Cin), lambda n, s: (0, 0)),
                pl.BlockSpec((Cin, Cout_p), lambda n, s: (0, 0)),
            ],
            out_specs=pl.BlockSpec((1, TS, Cout_p), lambda n, s: (n, s, 0)),
        ),
        compiler_params=pltpu.CompilerParams(
            dimension_semantics=("parallel", "parallel"),
            vmem_limit_bytes=32 << 20,
        ),
    )(xt, scale.reshape(1, Cin), shift.reshape(1, Cin), w)

    out_nhwc = out_flat[..., :Cout].reshape(N, HO, WO, Cout)
    # NHWC -> NCHW for the PyTorch interface, cast back to the input dtype.
    return jnp.transpose(out_nhwc, (0, 3, 1, 2)).astype(x_nchw.dtype)


def _reference(x_nchw, gamma, beta, conv_w, eps=1e-5):
    # Pure-JAX f32 reference: train-mode BN, ReLU, 1x1 conv, 2x2 avg pool.
    mean = x_nchw.mean(axis=(0, 2, 3), keepdims=True)
    var = ((x_nchw - mean) ** 2).mean(axis=(0, 2, 3), keepdims=True)
    y = (x_nchw - mean) / jnp.sqrt(var + eps)
    y = y * gamma[None, :, None, None] + beta[None, :, None, None]
    y = jnp.maximum(y, 0.0)
    w2 = conv_w.reshape(conv_w.shape[0], conv_w.shape[1])
    z = jnp.einsum("nchw,oc->nohw", y, w2)
    Nz, Co, H, W = z.shape
    z = z.reshape(Nz, Co, H // 2, 2, W // 2, 2).mean(axis=(3, 5))
    return z


if __name__ == "__main__":
    key = jax.random.PRNGKey(0)
    k_x, k_g, k_b, k_w = jax.random.split(key, 4)

    N, Cin, H, W = 2, 8, 16, 16
    Cout = 4

    x = jax.random.normal(k_x, (N, Cin, H, W), dtype=jnp.float32)
    gamma = 1.0 + 0.1 * jax.random.normal(k_g, (Cin,), dtype=jnp.float32)
    beta = 0.1 * jax.random.normal(k_b, (Cin,), dtype=jnp.float32)
    conv_w = jax.random.normal(k_w, (Cout, Cin, 1, 1), dtype=jnp.float32) * (
        1.0 / np.sqrt(Cin)
    )

    out = transition_layer(x, gamma, beta, conv_w)
    out = jax.block_until_ready(out)

    ref = _reference(x, gamma, beta, conv_w)
    # Tolerance reflects bf16 activations/weights/output with f32 accumulation.
    np.testing.assert_allclose(np.asarray(out), np.asarray(ref), atol=3e-2, rtol=3e-2)
    assert out.shape == (N, Cout, H // 2, W // 2)
    print("KERNEL_OK")
</pallas_src>

<mosaic_0001>
module attributes {stable_mosaic.version = 11 : i64} {
  func.func @_transition_kernel(%arg0: i32, %arg1: i32, %arg2: memref<1x2x2x64x8xbf16, #tpu.memory_space<vmem>>, %arg3: memref<1x8xf32, #tpu.memory_space<vmem>>, %arg4: memref<1x8xf32, #tpu.memory_space<vmem>>, %arg5: memref<8x128xbf16, #tpu.memory_space<vmem>>, %arg6: memref<1x64x128xbf16, #tpu.memory_space<vmem>>) attributes {dimension_semantics = [#tpu.dimension_semantics<parallel>, #tpu.dimension_semantics<parallel>], iteration_bounds = array<i64: 2, 1>, scalar_prefetch = 0 : i64, scratch_operands = 0 : i64, tpu.core_type = #tpu.core_type<tc>, window_params = [{transform_indices = @transform_0, window_bounds = array<i64: 1, 2, 2, 64, 8>}, {pipeline_mode = #tpu.pipeline_mode<synchronous>, transform_indices = @transform_1, window_bounds = array<i64: 1, 8>}, {pipeline_mode = #tpu.pipeline_mode<synchronous>, transform_indices = @transform_2, window_bounds = array<i64: 1, 8>}, {pipeline_mode = #tpu.pipeline_mode<synchronous>, transform_indices = @transform_3, window_bounds = array<i64: 8, 128>}, {transform_indices = @transform_4, window_bounds = array<i64: 1, 64, 128>}]} {
    %c0 = arith.constant 0 : index
    %c0_0 = arith.constant 0 : index
    %0 = vector.load %arg3[%c0, %c0_0] : memref<1x8xf32, #tpu.memory_space<vmem>>, vector<1x8xf32>
    %c0_1 = arith.constant 0 : index
    %c0_2 = arith.constant 0 : index
    %1 = vector.load %arg4[%c0_1, %c0_2] : memref<1x8xf32, #tpu.memory_space<vmem>>, vector<1x8xf32>
    %c0_3 = arith.constant 0 : index
    %c0_4 = arith.constant 0 : index
    %c0_5 = arith.constant 0 : index
    %c0_6 = arith.constant 0 : index
    %c0_7 = arith.constant 0 : index
    %2 = vector.load %arg2[%c0_3, %c0_4, %c0_5, %c0_6, %c0_7] : memref<1x2x2x64x8xbf16, #tpu.memory_space<vmem>>, vector<1x1x1x64x8xbf16>
    %3 = vector.shape_cast %2 : vector<1x1x1x64x8xbf16> to vector<64x8xbf16>
    %4 = arith.extf %3 : vector<64x8xbf16> to vector<64x8xf32>
    %5 = vector.broadcast %0 : vector<1x8xf32> to vector<64x8xf32>
    %6 = arith.mulf %4, %5 : vector<64x8xf32>
    %7 = vector.broadcast %1 : vector<1x8xf32> to vector<64x8xf32>
    %8 = arith.addf %6, %7 : vector<64x8xf32>
    %cst = arith.constant 0.000000e+00 : f32
    %9 = vector.broadcast %cst : f32 to vector<64x8xf32>
    %10 = arith.maximumf %8, %9 : vector<64x8xf32>
    %c0_8 = arith.constant 0 : index
    %c0_9 = arith.constant 0 : index
    %c1 = arith.constant 1 : index
    %c0_10 = arith.constant 0 : index
    %c0_11 = arith.constant 0 : index
    %11 = vector.load %arg2[%c0_8, %c0_9, %c1, %c0_10, %c0_11] : memref<1x2x2x64x8xbf16, #tpu.memory_space<vmem>>, vector<1x1x1x64x8xbf16>
    %12 = vector.shape_cast %11 : vector<1x1x1x64x8xbf16> to vector<64x8xbf16>
    %13 = arith.extf %12 : vector<64x8xbf16> to vector<64x8xf32>
    %14 = vector.broadcast %0 : vector<1x8xf32> to vector<64x8xf32>
    %15 = arith.mulf %13, %14 : vector<64x8xf32>
    %16 = vector.broadcast %1 : vector<1x8xf32> to vector<64x8xf32>
    %17 = arith.addf %15, %16 : vector<64x8xf32>
    %cst_12 = arith.constant 0.000000e+00 : f32
    %18 = vector.broadcast %cst_12 : f32 to vector<64x8xf32>
    %19 = arith.maximumf %17, %18 : vector<64x8xf32>
    %20 = arith.addf %10, %19 : vector<64x8xf32>
    %c0_13 = arith.constant 0 : index
    %c1_14 = arith.constant 1 : index
    %c0_15 = arith.constant 0 : index
    %c0_16 = arith.constant 0 : index
    %c0_17 = arith.constant 0 : index
    %21 = vector.load %arg2[%c0_13, %c1_14, %c0_15, %c0_16, %c0_17] : memref<1x2x2x64x8xbf16, #tpu.memory_space<vmem>>, vector<1x1x1x64x8xbf16>
    %22 = vector.shape_cast %21 : vector<1x1x1x64x8xbf16> to vector<64x8xbf16>
    %23 = arith.extf %22 : vector<64x8xbf16> to vector<64x8xf32>
    %24 = vector.broadcast %0 : vector<1x8xf32> to vector<64x8xf32>
    %25 = arith.mulf %23, %24 : vector<64x8xf32>
    %26 = vector.broadcast %1 : vector<1x8xf32> to vector<64x8xf32>
    %27 = arith.addf %25, %26 : vector<64x8xf32>
    %cst_18 = arith.constant 0.000000e+00 : f32
    %28 = vector.broadcast %cst_18 : f32 to vector<64x8xf32>
    %29 = arith.maximumf %27, %28 : vector<64x8xf32>
    %30 = arith.addf %20, %29 : vector<64x8xf32>
    %c0_19 = arith.constant 0 : index
    %c1_20 = arith.constant 1 : index
    %c1_21 = arith.constant 1 : index
    %c0_22 = arith.constant 0 : index
    %c0_23 = arith.constant 0 : index
    %31 = vector.load %arg2[%c0_19, %c1_20, %c1_21, %c0_22, %c0_23] : memref<1x2x2x64x8xbf16, #tpu.memory_space<vmem>>, vector<1x1x1x64x8xbf16>
    %32 = vector.shape_cast %31 : vector<1x1x1x64x8xbf16> to vector<64x8xbf16>
    %33 = arith.extf %32 : vector<64x8xbf16> to vector<64x8xf32>
    %34 = vector.broadcast %0 : vector<1x8xf32> to vector<64x8xf32>
    %35 = arith.mulf %33, %34 : vector<64x8xf32>
    %36 = vector.broadcast %1 : vector<1x8xf32> to vector<64x8xf32>
    %37 = arith.addf %35, %36 : vector<64x8xf32>
    %cst_24 = arith.constant 0.000000e+00 : f32
    %38 = vector.broadcast %cst_24 : f32 to vector<64x8xf32>
    %39 = arith.maximumf %37, %38 : vector<64x8xf32>
    %40 = arith.addf %30, %39 : vector<64x8xf32>
    %41 = arith.truncf %40 : vector<64x8xf32> to vector<64x8xbf16>
    %c0_25 = arith.constant 0 : index
    %c0_26 = arith.constant 0 : index
    %42 = vector.load %arg5[%c0_25, %c0_26] : memref<8x128xbf16, #tpu.memory_space<vmem>>, vector<8x128xbf16>
    %cst_27 = arith.constant dense<0.000000e+00> : vector<64x128xf32>
    %43 = tpu.matmul %41, %42, %cst_27 {dimension_numbers = #tpu.dot_dimension_numbers<[1], [0], [0], [1], [0, 0, 1, 1], [], []>} : vector<64x8xbf16>, vector<8x128xbf16>, vector<64x128xf32> -> vector<64x128xf32>
    %44 = arith.truncf %43 : vector<64x128xf32> to vector<64x128xbf16>
    %c0_28 = arith.constant 0 : index
    %c0_29 = arith.constant 0 : index
    %c0_30 = arith.constant 0 : index
    %45 = vector.load %arg6[%c0_28, %c0_29, %c0_30] : memref<1x64x128xbf16, #tpu.memory_space<vmem>>, vector<1x64x128xbf16>
    %46 = vector.shape_cast %45 : vector<1x64x128xbf16> to vector<64x128xbf16>
    %47 = vector.shape_cast %44 : vector<64x128xbf16> to vector<1x64x128xbf16>
    tpu.vector_store %arg6[%c0_28, %c0_29, %c0_30], %47 {strides = array<i32>} : memref<1x64x128xbf16, #tpu.memory_space<vmem>>, vector<1x64x128xbf16>,
    return
  }
  func.func @transform_0(%arg0: i32, %arg1: i32) -> (i32, i32, i32, i32, i32) {
    %c0_i32 = arith.constant 0 : i32
    %c0_i32_0 = arith.constant 0 : i32
    %c0_i32_1 = arith.constant 0 : i32
    %c0_i32_2 = arith.constant 0 : i32
    return %arg0, %c0_i32, %c0_i32_0, %arg1, %c0_i32_1 : i32, i32, i32, i32, i32
  }
  func.func @transform_1(%arg0: i32, %arg1: i32) -> (i32, i32) {
    %c0_i32 = arith.constant 0 : i32
    %c0_i32_0 = arith.constant 0 : i32
    %c0_i32_1 = arith.constant 0 : i32
    return %c0_i32, %c0_i32_0 : i32, i32
  }
  func.func @transform_2(%arg0: i32, %arg1: i32) -> (i32, i32) {
    %c0_i32 = arith.constant 0 : i32
    %c0_i32_0 = arith.constant 0 : i32
    %c0_i32_1 = arith.constant 0 : i32
    return %c0_i32, %c0_i32_0 : i32, i32
  }
  func.func @transform_3(%arg0: i32, %arg1: i32) -> (i32, i32) {
    %c0_i32 = arith.constant 0 : i32
    %c0_i32_0 = arith.constant 0 : i32
    %c0_i32_1 = arith.constant 0 : i32
    return %c0_i32, %c0_i32_0 : i32, i32
  }
  func.func @transform_4(%arg0: i32, %arg1: i32) -> (i32, i32, i32) {
    %c0_i32 = arith.constant 0 : i32
    %c0_i32_0 = arith.constant 0 : i32
    return %arg0, %arg1, %c0_i32 : i32, i32, i32
  }
}

</mosaic_0001>

<bundles_post_ra>
// kernel: transition_layer.1
= control target key start
LH: loop header
LB: loop body
LE: loop exit
PB: predicated region body
PF: predicated region fallthrough
CT: control target
= control target key end

     0   :  { %s808_s15 = smov 0   ;;  %s810_s16 = smov 0   ;;  %s944_s0 = inlined_call_operand.vmem [shape: bf16[2,2,2,64,8], index: 0, kind: input, shape index: {}]   ;;  %s945_s1 = inlined_call_operand.vmem [shape: f32[1,8], index: 1, kind: input, shape index: {}]   ;;  %s946_s2 = inlined_call_operand.vmem [shape: f32[1,8], index: 2, kind: input, shape index: {}]   ;;  %s947_s3 = inlined_call_operand.vmem [shape: bf16[8,128], index: 3, kind: input, shape index: {}]   ;;  %s948_s4 = inlined_call_operand.vmem [shape: bf16[2,64,128], index: 4, kind: output, shape index: {}]  }
   0x1   :  { %s812_s17 = smov 0  }
   0x2 LB: > { %s26_s18 = sadd.s32 1, %s777_s16  ;;  %p591_p0 = scmp.ge.s32.totalorder %s781_s17, 1  ;;  %s781_s17 = sphi %s812_s17, %s14_s17   ;;  %s777_s16 = sphi %s810_s16, %s950_s16   ;;  %s773_s15 = sphi %s808_s15, %s949_s15  }
   0x3   : > { %p28_p1 = scmp.ge.s32.totalorder %s26_s18, 2  ;;  %p183_p2 = scmp.lt.s32.totalorder %s781_s17, 3 }
   0x5   : > { %s952_s18 = smov (%p28_p1, %s26_s18), 0  ;;  %p184_p3 = pnand %p591_p0, %p183_p2 }
   0x6   : > { %p218_p4 = scmp.lt.s32.totalorder (!%p184_p3), %s773_s15, 1 }
   0x7   : > { %187 = sbr.rel (%p184_p3) target bundleno = 205 (0xcd), region = 36 }
   0xc   : > { %v437_v0 = vld [vmem:[%s947_s3] sm:$0xf]  ;;  %vm451_vm0 = vcmask 1043456   ;;  %s954_s15 = smov (!%p218_p4, %s773_s15), 1  ;;  %vm438_vm1 = vcmask 64512  }
   0xd   : > { %v453_v1 = vsel %vm451_vm0, %v437_v0, 0  ;;  %s626_s21 = sshll.u32 %s954_s15, 7  ;;  %v840_v2 = vld [vmem:[%s945_s1] ss:$0 sm:$0xff]  ;;  %s627_s29 = sshll.u32 %s954_s15, 5 }
   0xe   : > { %462 = vmatpush.bf16.msra.mxu0 %v453_v1  ;;  %730 = vmatpush.bf16.msra.mxu1 %v453_v1  ;;  %s835_s24 = scalar_lea.vmem %s944_s0, %s626_s21  ;;  %v848_v8 = vld [vmem:[%s946_s2] ss:$0 sm:$0xff]  ;;  %s235_s6 = scalar_lea.vmem %s948_s4, %s627_s29 }
   0xf   : > { %731 = vmatpush.bf16.msra.mxu2 %v453_v1  ;;  %732 = vmatpush.bf16.msra.mxu3 %v453_v1  ;;  %v629_v3 = vld [vmem:[%s835_s24] sm:$0xff]   ;;  %v712_v32 = vld [vmem:[%s835_s24 + $0x8] sm:$0xff]  }
  0x10   : > { %v715_v4 = vld [vmem:[%s835_s24 + $0x20] sm:$0xff]   ;;  %v630_v6 = vunpack.c.l.bf16 %v629_v3  ;;  %v631_v7 = vunpack.c.h.bf16 %v629_v3  ;;  %v716_v37 = vld [vmem:[%s835_s24 + $0x28] sm:$0xff]   ;;  %v634_v45 = vunpack.c.l.bf16 %v712_v32  ;;  %v635_v46 = vunpack.c.h.bf16 %v712_v32 }
  0x11   : > { %v719_v5 = vld [vmem:[%s835_s24 + $0x40] sm:$0xff]   ;;  %v646_v9 = vunpack.c.l.bf16 %v715_v4  ;;  %v647_v10 = vunpack.c.h.bf16 %v715_v4  ;;  %v720_v38 = vld [vmem:[%s835_s24 + $0x48] sm:$0xff]   ;;  %v650_v47 = vunpack.c.l.bf16 %v716_v37  ;;  %v651_v48 = vunpack.c.h.bf16 %v716_v37 }
  0x12   : > { %v723_v11 = vld [vmem:[%s835_s24 + $0x60] sm:$0xff]   ;;  %v662_v12 = vunpack.c.l.bf16 %v719_v5  ;;  %v663_v13 = vunpack.c.h.bf16 %v719_v5  ;;  %v259_v16 = vmul.f32 %v840_v2, %v630_v6  ;;  %v260_v17 = vmul.f32 %v840_v2, %v631_v7  ;;  %v724_v59 = vld [vmem:[%s835_s24 + $0x68] sm:$0xff]   ;;  %v713_v5 = vld [vmem:[%s835_s24 + $0x10] sm:$0xff]  }
  0x13   : > { %v678_v14 = vunpack.c.l.bf16 %v723_v11  ;;  %v679_v15 = vunpack.c.h.bf16 %v723_v11  ;;  %v303_v18 = vmul.f32 %v840_v2, %v646_v9  ;;  %v304_v19 = vmul.f32 %v840_v2, %v647_v10  ;;  %v717_v11 = vld [vmem:[%s835_s24 + $0x30] sm:$0xff]  }
  0x14   : > { %v352_v20 = vmul.f32 %v840_v2, %v662_v12  ;;  %v353_v21 = vmul.f32 %v840_v2, %v663_v13  ;;  %v270_v24 = vadd.f32 %v848_v8, %v259_v16  ;;  %v271_v25 = vadd.f32 %v848_v8, %v260_v17 }
  0x15   : > { %v401_v22 = vmul.f32 %v840_v2, %v678_v14  ;;  %v402_v23 = vmul.f32 %v840_v2, %v679_v15  ;;  %v311_v26 = vadd.f32 %v848_v8, %v303_v18  ;;  %v312_v27 = vadd.f32 %v848_v8, %v304_v19 }
  0x16   : > { %v360_v28 = vadd.f32 %v848_v8, %v352_v20  ;;  %v361_v29 = vadd.f32 %v848_v8, %v353_v21  ;;  %v278_v33 = vmax.f32 %v270_v24, 0.0  ;;  %v279_v34 = vmax.f32 %v271_v25, 0.0 }
  0x17   : > { %v409_v30 = vadd.f32 %v848_v8, %v401_v22  ;;  %v410_v31 = vadd.f32 %v848_v8, %v402_v23  ;;  %v319_v35 = vmax.f32 %v311_v26, 0.0  ;;  %v320_v36 = vmax.f32 %v312_v27, 0.0 }
  0x18   : > { %v368_v39 = vmax.f32 %v360_v28, 0.0  ;;  %v369_v40 = vmax.f32 %v361_v29, 0.0  ;;  %v666_v49 = vunpack.c.l.bf16 %v720_v38  ;;  %v667_v50 = vunpack.c.h.bf16 %v720_v38  ;;  %v721_v28 = vld [vmem:[%s835_s24 + $0x50] sm:$0xff]  }
  0x19   : > { %v417_v41 = vmax.f32 %v409_v30, 0.0  ;;  %v418_v42 = vmax.f32 %v410_v31, 0.0  ;;  %v327_v43 = vadd.f32 %v319_v35, %v278_v33  ;;  %v328_v44 = vadd.f32 %v320_v36, %v279_v34 }
  0x1a   : > { %v261_v53 = vmul.f32 %v840_v2, %v634_v45  ;;  %v262_v54 = vmul.f32 %v840_v2, %v635_v46  ;;  %v305_v55 = vmul.f32 %v840_v2, %v650_v47  ;;  %v306_v56 = vmul.f32 %v840_v2, %v651_v48 }
  0x1b   : > { %v376_v51 = vadd.f32 %v368_v39, %v327_v43  ;;  %v377_v52 = vadd.f32 %v369_v40, %v328_v44  ;;  %v354_v57 = vmul.f32 %v840_v2, %v666_v49  ;;  %v355_v58 = vmul.f32 %v840_v2, %v667_v50 }
  0x1c   : > { %v272_v62 = vadd.f32 %v848_v8, %v261_v53  ;;  %v273_v63 = vadd.f32 %v848_v8, %v262_v54  ;;  %v313_v0 = vadd.f32 %v848_v8, %v305_v55  ;;  %v314_v1 = vadd.f32 %v848_v8, %v306_v56  ;;  %v718_v55 = vld [vmem:[%s835_s24 + $0x38] sm:$0xff]  }
  0x1d   : > { %v425_v60 = vadd.f32 %v417_v41, %v376_v51  ;;  %v426_v61 = vadd.f32 %v418_v42, %v377_v52  ;;  %v362_v3 = vadd.f32 %v848_v8, %v354_v57  ;;  %v363_v4 = vadd.f32 %v848_v8, %v355_v58  ;;  %v725_v41 = vld [vmem:[%s835_s24 + $0x70] sm:$0xff]   ;;  %v714_v42 = vld [vmem:[%s835_s24 + $0x18] sm:$0xff]  }
  0x1e   : > { %v280_v7 = vmax.f32 %v272_v62, 0.0  ;;  %v281_v9 = vmax.f32 %v273_v63, 0.0  ;;  %v682_v10 = vunpack.c.l.bf16 %v724_v59  ;;  %v321_v12 = vmax.f32 %v313_v0, 0.0 }
  0x1f   : > { %v433_v6 = vpack.c.bf16 %v426_v61, %v425_v60  ;;  %v322_v13 = vmax.f32 %v314_v1, 0.0  ;;  %v370_v14 = vmax.f32 %v362_v3, 0.0  ;;  %v371_v15 = vmax.f32 %v363_v4, 0.0 }
  0x20   : > { %v683_v16 = vunpack.c.h.bf16 %v724_v59  ;;  %v403_v17 = vmul.f32 %v840_v2, %v682_v10  ;;  %v638_v18 = vunpack.c.l.bf16 %v713_v5  ;;  %v639_v19 = vunpack.c.h.bf16 %v713_v5  ;;  %v722_v10 = vld [vmem:[%s835_s24 + $0x58] sm:$0xff]  }
  0x21   : > { %620 = vmatmul.msk.bf16.vlgmr.msra.gmra.mxu0 %vm438_vm1, %v433_v6  ;;  %v329_v20 = vadd.f32 %v321_v12, %v280_v7  ;;  %v330_v21 = vadd.f32 %v322_v13, %v281_v9  ;;  %v654_v22 = vunpack.c.l.bf16 %v717_v11  ;;  %v655_v23 = vunpack.c.h.bf16 %v717_v11 }
  0x22   : > { %v404_v24 = vmul.f32 %v840_v2, %v683_v16  ;;  %v411_v25 = vadd.f32 %v848_v8, %v403_v17  ;;  %v263_v26 = vmul.f32 %v840_v2, %v638_v18  ;;  %v264_v27 = vmul.f32 %v840_v2, %v639_v19  ;;  %v726_v19 = vld [vmem:[%s835_s24 + $0x78] sm:$0xff]  }
  0x23   : > { %v378_v29 = vadd.f32 %v370_v14, %v329_v20  ;;  %v379_v30 = vadd.f32 %v371_v15, %v330_v21  ;;  %v307_v31 = vmul.f32 %v840_v2, %v654_v22  ;;  %v308_v32 = vmul.f32 %v840_v2, %v655_v23 }
  0x24   : > { %v412_v33 = vadd.f32 %v848_v8, %v404_v24  ;;  %v419_v34 = vmax.f32 %v411_v25, 0.0  ;;  %v274_v35 = vadd.f32 %v848_v8, %v263_v26  ;;  %v275_v36 = vadd.f32 %v848_v8, %v264_v27 }
  0x25   : > { %v315_v37 = vadd.f32 %v848_v8, %v307_v31  ;;  %v316_v38 = vadd.f32 %v848_v8, %v308_v32  ;;  %v670_v39 = vunpack.c.l.bf16 %v721_v28  ;;  %v671_v40 = vunpack.c.h.bf16 %v721_v28 }
  0x26   : > { %v420_v43 = vmax.f32 %v412_v33, 0.0  ;;  %v427_v44 = vadd.f32 %v419_v34, %v378_v29  ;;  %v282_v45 = vmax.f32 %v274_v35, 0.0  ;;  %v283_v46 = vmax.f32 %v275_v36, 0.0 }
  0x27   : > { %v323_v47 = vmax.f32 %v315_v37, 0.0  ;;  %v324_v48 = vmax.f32 %v316_v38, 0.0  ;;  %v356_v49 = vmul.f32 %v840_v2, %v670_v39  ;;  %v357_v50 = vmul.f32 %v840_v2, %v671_v40 }
  0x28   : > { %v428_v51 = vadd.f32 %v420_v43, %v379_v30  ;;  %v686_v52 = vunpack.c.l.bf16 %v725_v41  ;;  %v687_v53 = vunpack.c.h.bf16 %v725_v41  ;;  %v642_v54 = vunpack.c.l.bf16 %v714_v42 }
  0x29   : > { %v331_v56 = vadd.f32 %v323_v47, %v282_v45  ;;  %v332_v57 = vadd.f32 %v324_v48, %v283_v46  ;;  %v364_v58 = vadd.f32 %v848_v8, %v356_v49  ;;  %v365_v59 = vadd.f32 %v848_v8, %v357_v50 }
  0x2a   : > { %v434_v60 = vpack.c.bf16 %v428_v51, %v427_v44  ;;  %v405_v61 = vmul.f32 %v840_v2, %v686_v52  ;;  %v406_v62 = vmul.f32 %v840_v2, %v687_v53  ;;  %v643_v63 = vunpack.c.h.bf16 %v714_v42 }
  0x2b   : > { %v372_v0 = vmax.f32 %v364_v58, 0.0  ;;  %v373_v1 = vmax.f32 %v365_v59, 0.0  ;;  %v265_v3 = vmul.f32 %v840_v2, %v642_v54  ;;  %v658_v4 = vunpack.c.l.bf16 %v718_v55 }
  0x2c   : > { %621 = vmatmul.msk.bf16.vlgmr.msra.gmra.mxu1 %vm438_vm1, %v434_v60  ;;  %v413_v5 = vadd.f32 %v848_v8, %v405_v61  ;;  %v414_v6 = vadd.f32 %v848_v8, %v406_v62  ;;  %v266_v7 = vmul.f32 %v840_v2, %v643_v63  ;;  %v659_v9 = vunpack.c.h.bf16 %v718_v55 }
  0x2d   : > { %v380_v11 = vadd.f32 %v372_v0, %v331_v56  ;;  %v381_v12 = vadd.f32 %v373_v1, %v332_v57  ;;  %v276_v13 = vadd.f32 %v848_v8, %v265_v3  ;;  %v309_v14 = vmul.f32 %v840_v2, %v658_v4 }
  0x2e   : > { %v421_v15 = vmax.f32 %v413_v5, 0.0  ;;  %v422_v16 = vmax.f32 %v414_v6, 0.0  ;;  %v277_v17 = vadd.f32 %v848_v8, %v266_v7  ;;  %v310_v18 = vmul.f32 %v840_v2, %v659_v9 }
  0x2f   : > { %v284_v20 = vmax.f32 %v276_v13, 0.0  ;;  %v317_v21 = vadd.f32 %v848_v8, %v309_v14  ;;  %v674_v22 = vunpack.c.l.bf16 %v722_v10  ;;  %v675_v23 = vunpack.c.h.bf16 %v722_v10 }
  0x30   : > { %v429_v24 = vadd.f32 %v421_v15, %v380_v11  ;;  %v430_v25 = vadd.f32 %v422_v16, %v381_v12  ;;  %v285_v26 = vmax.f32 %v277_v17, 0.0  ;;  %v318_v27 = vadd.f32 %v848_v8, %v310_v18 }
  0x31   : > { %v325_v28 = vmax.f32 %v317_v21, 0.0  ;;  %v358_v29 = vmul.f32 %v840_v2, %v674_v22  ;;  %v359_v30 = vmul.f32 %v840_v2, %v675_v23  ;;  %v690_v31 = vunpack.c.l.bf16 %v726_v19 }
  0x32   : > { %v435_v32 = vpack.c.bf16 %v430_v25, %v429_v24  ;;  %v326_v33 = vmax.f32 %v318_v27, 0.0  ;;  %v691_v34 = vunpack.c.h.bf16 %v726_v19 }
  0x33   : > { %v333_v35 = vadd.f32 %v325_v28, %v284_v20  ;;  %v366_v36 = vadd.f32 %v848_v8, %v358_v29  ;;  %v367_v37 = vadd.f32 %v848_v8, %v359_v30  ;;  %v407_v38 = vmul.f32 %v840_v2, %v690_v31 }
  0x34   : > { %622 = vmatmul.msk.bf16.vlgmr.msra.gmra.mxu2 %vm438_vm1, %v435_v32  ;;  %v334_v39 = vadd.f32 %v326_v33, %v285_v26  ;;  %v408_v40 = vmul.f32 %v840_v2, %v691_v34 }
  0x35   : > { %v374_v41 = vmax.f32 %v366_v36, 0.0  ;;  %v375_v42 = vmax.f32 %v367_v37, 0.0  ;;  %v415_v43 = vadd.f32 %v848_v8, %v407_v38 }
  0x36   : > { %v416_v44 = vadd.f32 %v848_v8, %v408_v40 }
  0x37   : > { %v382_v45 = vadd.f32 %v374_v41, %v333_v35  ;;  %v383_v46 = vadd.f32 %v375_v42, %v334_v39  ;;  %v423_v47 = vmax.f32 %v415_v43, 0.0 }
  0x38   : > { %v424_v48 = vmax.f32 %v416_v44, 0.0 }
  0x39   : > { %v431_v49 = vadd.f32 %v423_v47, %v382_v45 }
  0x3a   : > { %v432_v50 = vadd.f32 %v424_v48, %v383_v46 }
  0x3c   : > { %v436_v51 = vpack.c.bf16 %v432_v50, %v431_v49 }
  0x3e   : > { %623 = vmatmul.msk.bf16.vlgmr.msra.gmra.mxu3 %vm438_vm1, %v436_v51 }
  0x9e   : > { %v464_v52 = vpop.f32.mrf.mxu0 }
  0xa6   : > { %v466_v2 = vpop.f32.mrf.mxu0 }
  0xa7   : > { %v695_v53 = vpack.c.bf16 %v466_v2, %v464_v52 }
  0xa9   : > { %696 = vst [vmem:[%s235_s6] sm:$0xff] %v695_v53   ;;  %v469_v54 = vpop.f32.mrf.mxu1 }
  0xb1   : > { %v471_v8 = vpop.f32.mrf.mxu1 }
  0xb2   : > { %v700_v55 = vpack.c.bf16 %v471_v8, %v469_v54 }
  0xb4   : > { %727 = vst [vmem:[%s235_s6 + $0x8] sm:$0xff] %v700_v55  }
  0xb7   : > { %v474_v56 = vpop.f32.mrf.mxu2 }
  0xbf   : > { %v476_v57 = vpop.f32.mrf.mxu2 }
  0xc0   : > { %v705_v58 = vpack.c.bf16 %v476_v57, %v474_v56 }
  0xc1   : > { %v479_v59 = vpop.f32.mrf.mxu3 }
  0xc2   : > { %728 = vst [vmem:[%s235_s6 + $0x10] sm:$0xff] %v705_v58  }
  0xc9   : > { %v481_v60 = vpop.f32.mrf.mxu3 }
  0xca   : > { %v710_v61 = vpack.c.bf16 %v481_v60, %v479_v59 }
  0xcc   : > { %729 = vst [vmem:[%s235_s6 + $0x18] sm:$0xff] %v710_v61  }
  0xcd PF: > { %s14_s17 = sadd.s32 1, %s781_s17   ;;  %s949_s15 = smov %s777_s16 }
  0xce   : > { %p11_p5 = scmp.ge.s32.totalorder %s14_s17, 4   ;;  %s950_s16 = smov %s952_s18 }
  0xd0   :  { %13 = sbr.rel (!%p11_p5) target bundleno = 2 (0x2), region = 69 }

</bundles_post_ra>
